<compile_context>
chip_gen: v6e
topology: v6e:2x2x1
jax: 0.10.0
libtpu: 0.0.40
codegen_flags: <defaults>
</compile_context>

<pallas_src>
import functools

import numpy as np
import jax
import jax.numpy as jnp
from jax.experimental import pallas as pl
from jax.experimental.pallas import tpu as pltpu

BN_EPS = 1e-5
NORM_EPS = 1e-12  # torch.nn.functional.normalize default eps
LANE = 128
SUBLANE = 8
MAX_TILE_N = 512


def _round_up(x, m):
    return ((x + m - 1) // m) * m


def _leaky_relu(x, slope=0.2):
    return jnp.where(x >= 0, x, slope * x)


def _softplus(x):
    # numerically stable softplus; exp/log1p go to the EUP slot.
    return jnp.maximum(x, 0.0) + jnp.log1p(jnp.exp(-jnp.abs(x)))


def vposer_kernel(
    x_ref, eps_ref,
    w1, b1, w2, b2,            # encoder (BN folded into these in the wrapper)
    wh, bh,                    # fused mu|logvar head
    wd1, bd1, wd2, bd2,        # decoder MLP
    wo, bo,                    # decoder out (planar, padded)
    ms_ref, pose_ref,
):
    # ---------------- encoder ----------------
    h = _leaky_relu(jnp.dot(x_ref[...], w1[...], preferred_element_type=jnp.float32) + b1[...])
    # dropout: identity (eval mode)
    h = _leaky_relu(jnp.dot(h, w2[...], preferred_element_type=jnp.float32) + b2[...])

    head = jnp.dot(h, wh[...], preferred_element_type=jnp.float32) + bh[...]  # (T, 2*Lp)
    Lp = head.shape[1] // 2
    mu = head[:, :Lp]
    std = _softplus(head[:, Lp:])
    ms_ref[:, :Lp] = mu
    ms_ref[:, Lp:] = std

    # --------------- reparameterize -----------
    z = mu + std * eps_ref[...]

    # ---------------- decoder ----------------
    d = _leaky_relu(jnp.dot(z, wd1[...], preferred_element_type=jnp.float32) + bd1[...])
    # dropout: identity (eval mode)
    d = _leaky_relu(jnp.dot(d, wd2[...], preferred_element_type=jnp.float32) + bd2[...])
    o = jnp.dot(d, wo[...], preferred_element_type=jnp.float32) + bo[...]  # (T, 6*Jp) planar

    Jp = pose_ref.shape[1] // 9

    # ContinousRotReprDecoder — element-wise over 128-lane-aligned (T, Jp) planes.
    ax = o[:, 0 * Jp:1 * Jp]
    bx = o[:, 1 * Jp:2 * Jp]
    ay = o[:, 2 * Jp:3 * Jp]
    by = o[:, 3 * Jp:4 * Jp]
    az = o[:, 4 * Jp:5 * Jp]
    bz = o[:, 5 * Jp:6 * Jp]

    inv_na = jax.lax.rsqrt(jnp.maximum(ax * ax + ay * ay + az * az, NORM_EPS * NORM_EPS))
    b1x = ax * inv_na
    b1y = ay * inv_na
    b1z = az * inv_na
    # Store b1 components immediately (row-major R flatten: plane k = [b1x,b2x,b3x,b1y,...]).
    pose_ref[:, 0 * Jp:1 * Jp] = b1x
    pose_ref[:, 3 * Jp:4 * Jp] = b1y
    pose_ref[:, 6 * Jp:7 * Jp] = b1z

    dp = b1x * bx + b1y * by + b1z * bz
    ux = bx - dp * b1x
    uy = by - dp * b1y
    uz = bz - dp * b1z
    inv_nu = jax.lax.rsqrt(jnp.maximum(ux * ux + uy * uy + uz * uz, NORM_EPS * NORM_EPS))
    b2x = ux * inv_nu
    b2y = uy * inv_nu
    b2z = uz * inv_nu
    pose_ref[:, 1 * Jp:2 * Jp] = b2x
    pose_ref[:, 4 * Jp:5 * Jp] = b2y
    pose_ref[:, 7 * Jp:8 * Jp] = b2z

    pose_ref[:, 2 * Jp:3 * Jp] = b1y * b2z - b1z * b2y
    pose_ref[:, 5 * Jp:6 * Jp] = b1z * b2x - b1x * b2z
    pose_ref[:, 8 * Jp:9 * Jp] = b1x * b2y - b1y * b2x


@functools.partial(jax.jit, static_argnames=("num_joints",))
def vposer_forward(Pin, eps, params, num_joints):
    N = Pin.shape[0]
    J = num_joints
    x = Pin.reshape(N, -1).astype(jnp.float32)
    F = x.shape[1]
    H = params["enc_fc1_w"].shape[0]
    L = params["enc_mu_w"].shape[0]
    f32 = jnp.float32

    # Padded (lane-aligned) dimensions.
    Fp = _round_up(F, LANE)
    Hp = _round_up(H, LANE)
    Lp = _round_up(L, LANE)
    Jp = _round_up(J, LANE)

    # Batch tiling: minimal number of <=512-row tiles, rounded to the 8-row
    # sublane granule. Big tiles amortise per-step pipeline overhead while the
    # cap keeps double-buffered batch tiles well inside VMEM on v7x.
    nb = -(-N // MAX_TILE_N)
    TILE_N = _round_up(-(-N // nb), SUBLANE)
    Np = nb * TILE_N

    def pad2(a, r, c):
        a = a.astype(f32)
        return jnp.pad(a, ((0, r - a.shape[0]), (0, c - a.shape[1])))

    def padrow(v, c):
        v = v.astype(f32)
        return jnp.pad(v, (0, c - v.shape[0])).reshape(1, c)

    # ---- fold BatchNorm1d (running stats) into the adjacent Linear layers ----
    s1 = params["bn1_g"] / jnp.sqrt(params["bn1_rv"] + BN_EPS)
    t1 = params["bn1_b"] - params["bn1_rm"] * s1
    w1 = params["enc_fc1_w"].T * s1[:, None]                     # (F, H)
    b1 = params["enc_fc1_b"] + t1 @ params["enc_fc1_w"].T

    s2 = params["bn2_g"] / jnp.sqrt(params["bn2_rv"] + BN_EPS)
    t2 = params["bn2_b"] - params["bn2_rm"] * s2
    w2 = params["enc_fc2_w"].T * s2[:, None]                     # (H, H)
    b2 = params["enc_fc2_b"] + t2 @ params["enc_fc2_w"].T

    # ---- fused mu | logvar head, zero-padded to 2*Lp lanes ----
    wh = jnp.zeros((Hp, 2 * Lp), f32)
    wh = wh.at[:H, :L].set(params["enc_mu_w"].T.astype(f32))
    wh = wh.at[:H, Lp:Lp + L].set(params["enc_lv_w"].T.astype(f32))
    bh = jnp.zeros((1, 2 * Lp), f32)
    bh = bh.at[0, :L].set(params["enc_mu_b"].astype(f32))
    bh = bh.at[0, Lp:Lp + L].set(params["enc_lv_b"].astype(f32))

    # ---- decoder-out weight: permute to planar component-major columns and pad
    #      each of the 6 component planes to Jp lanes ----
    perm = np.asarray([j * 6 + c for c in range(6) for j in range(J)], dtype=np.int32)
    wout_pl = params["dec_out_w"].T[:, perm].astype(f32).reshape(H, 6, J)
    wout = jnp.pad(wout_pl, ((0, Hp - H), (0, 0), (0, Jp - J))).reshape(Hp, 6 * Jp)
    bout = jnp.pad(params["dec_out_b"][perm].astype(f32).reshape(6, J),
                   ((0, 0), (0, Jp - J))).reshape(1, 6 * Jp)

    inputs = (
        jnp.pad(x, ((0, Np - N), (0, Fp - F))),
        jnp.pad(eps.astype(f32), ((0, Np - N), (0, Lp - L))),
        pad2(w1, Fp, Hp), padrow(b1, Hp),
        pad2(w2, Hp, Hp), padrow(b2, Hp),
        wh, bh,
        pad2(params["dec_fc1_w"].T, Lp, Hp), padrow(params["dec_fc1_b"], Hp),
        pad2(params["dec_fc2_w"].T, Hp, Hp), padrow(params["dec_fc2_b"], Hp),
        wout, bout,
    )

    def batch_spec(width):
        return pl.BlockSpec((TILE_N, width), lambda i: (i, 0))

    def const_spec(a):
        return pl.BlockSpec(a.shape, lambda i: (0, 0))

    in_specs = [batch_spec(Fp), batch_spec(Lp)] + [const_spec(a) for a in inputs[2:]]
    out_specs = (batch_spec(2 * Lp), batch_spec(9 * Jp))
    out_shapes = (
        jax.ShapeDtypeStruct((Np, 2 * Lp), f32),   # mean | std (packed, padded)
        jax.ShapeDtypeStruct((Np, 9 * Jp), f32),   # pose, planar + padded
    )

    weight_elems = sum(int(np.prod(a.shape)) for a in inputs[2:])
    flops = 2 * Np * (Fp * Hp + 2 * Hp * Hp + Hp * 2 * Lp + Lp * Hp + Hp * 6 * Jp)
    transcendentals = Np * (2 * Lp + 2 * Jp)
    bytes_accessed = 4 * (Np * (Fp + Lp + 2 * Lp + 9 * Jp) + weight_elems)

    ms, pose_pl = pl.pallas_call(
        vposer_kernel,
        out_shape=out_shapes,
        grid=(nb,),
        in_specs=in_specs,
        out_specs=out_specs,
        compiler_params=pltpu.CompilerParams(
            dimension_semantics=("parallel",),
            vmem_limit_bytes=48 * 1024 * 1024,
        ),
        cost_estimate=pl.CostEstimate(
            flops=int(flops),
            transcendentals=int(transcendentals),
            bytes_accessed=int(bytes_accessed),
        ),
    )(*inputs)

    mean = ms[:N, :L]
    std = ms[:N, Lp:Lp + L]
    # planar (Np, 9*Jp): column k*Jp + j -> (N, 1, J, 9)
    pose = (pose_pl[:N].reshape(N, 9, Jp)[:, :, :J]
            .transpose(0, 2, 1).reshape(N, 1, J, 9))
    return {"mean": mean, "std": std, "pose_matrot": pose}


# ---------------------------------------------------------------------------
# Pure-JAX reference (mirrors the PyTorch forward in eval mode) for checking.
# ---------------------------------------------------------------------------
def vposer_ref(Pin, eps, params):
    N = Pin.shape[0]
    x = Pin.reshape(N, -1).astype(jnp.float32)

    def bn(v, g, b, rm, rv):
        return (v - rm) / jnp.sqrt(rv + BN_EPS) * g + b

    h = bn(x, params["bn1_g"], params["bn1_b"], params["bn1_rm"], params["bn1_rv"])
    h = jax.nn.leaky_relu(h @ params["enc_fc1_w"].T + params["enc_fc1_b"], 0.2)
    h = bn(h, params["bn2_g"], params["bn2_b"], params["bn2_rm"], params["bn2_rv"])
    h = jax.nn.leaky_relu(h @ params["enc_fc2_w"].T + params["enc_fc2_b"], 0.2)
    mu = h @ params["enc_mu_w"].T + params["enc_mu_b"]
    std = jax.nn.softplus(h @ params["enc_lv_w"].T + params["enc_lv_b"])
    z = mu + std * eps
    d = jax.nn.leaky_relu(z @ params["dec_fc1_w"].T + params["dec_fc1_b"], 0.2)
    d = jax.nn.leaky_relu(d @ params["dec_fc2_w"].T + params["dec_fc2_b"], 0.2)
    o = d @ params["dec_out_w"].T + params["dec_out_b"]           # (N, J*6)

    r = o.reshape(-1, 3, 2)
    a, b = r[:, :, 0], r[:, :, 1]
    b1 = a / jnp.maximum(jnp.linalg.norm(a, axis=1, keepdims=True), NORM_EPS)
    dot = jnp.sum(b1 * b, axis=1, keepdims=True)
    u = b - dot * b1
    b2 = u / jnp.maximum(jnp.linalg.norm(u, axis=1, keepdims=True), NORM_EPS)
    b3 = jnp.cross(b1, b2)
    R = jnp.stack([b1, b2, b3], axis=-1)                          # (N*J, 3, 3)
    pose = R.reshape(N, 1, -1, 9)
    return {"mean": mu, "std": std, "pose_matrot": pose}


def make_params(key, n_features, num_neurons, latentD, num_joints):
    ks = jax.random.split(key, 20)
    f32 = jnp.float32

    def lin(kw, kb, out_f, in_f):
        w = 0.1 * jax.random.normal(kw, (out_f, in_f), f32)
        b = 0.05 * jax.random.normal(kb, (out_f,), f32)
        return w, b

    params = {}
    params["bn1_g"] = 1.0 + 0.1 * jax.random.normal(ks[0], (n_features,), f32)
    params["bn1_b"] = 0.1 * jax.random.normal(ks[1], (n_features,), f32)
    params["bn1_rm"] = 0.1 * jax.random.normal(ks[2], (n_features,), f32)
    params["bn1_rv"] = 1.0 + 0.1 * jnp.abs(jax.random.normal(ks[3], (n_features,), f32))
    params["bn2_g"] = 1.0 + 0.1 * jax.random.normal(ks[4], (num_neurons,), f32)
    params["bn2_b"] = 0.1 * jax.random.normal(ks[5], (num_neurons,), f32)
    params["bn2_rm"] = 0.1 * jax.random.normal(ks[6], (num_neurons,), f32)
    params["bn2_rv"] = 1.0 + 0.1 * jnp.abs(jax.random.normal(ks[7], (num_neurons,), f32))
    params["enc_fc1_w"], params["enc_fc1_b"] = lin(ks[8], ks[9], num_neurons, n_features)
    params["enc_fc2_w"], params["enc_fc2_b"] = lin(ks[10], ks[11], num_neurons, num_neurons)
    params["enc_mu_w"], params["enc_mu_b"] = lin(ks[12], ks[13], latentD, num_neurons)
    params["enc_lv_w"], params["enc_lv_b"] = lin(ks[14], ks[15], latentD, num_neurons)
    params["dec_fc1_w"], params["dec_fc1_b"] = lin(ks[16], ks[17], num_neurons, latentD)
    params["dec_fc2_w"], params["dec_fc2_b"] = lin(ks[18], ks[19], num_neurons, num_neurons)
    kout_w, kout_b = jax.random.split(jax.random.fold_in(key, 123))
    params["dec_out_w"], params["dec_out_b"] = lin(kout_w, kout_b, num_joints * 6, num_neurons)
    return params


def _check(out, ref):
    for name in ("mean", "std", "pose_matrot"):
        assert out[name].shape == ref[name].shape, (name, out[name].shape, ref[name].shape)
        assert jnp.allclose(out[name], ref[name], atol=2e-4, rtol=2e-4), name


if __name__ == "__main__":
    # Small shapes consistent with the module: matrot input Nx1xJx9.
    J = 4
    data_shape = (1, J, 9)
    n_features = 1 * J * 9          # 36
    num_neurons = 32
    latentD = 8

    key = jax.random.PRNGKey(0)
    k_pin, k_eps, k_par = jax.random.split(key, 3)
    params = make_params(k_par, n_features, num_neurons, latentD, J)

    # --- small-batch test (single tile) ---
    N = 2
    Pin = jax.random.normal(k_pin, (N,) + data_shape, jnp.float32)
    eps = jax.random.normal(k_eps, (N, latentD), jnp.float32)   # rsample noise
    out = vposer_forward(Pin, eps, params, num_joints=J)
    jax.block_until_ready(out)
    _check(out, vposer_ref(Pin, eps, params))

    # --- larger-batch test (multiple grid steps + padded batch rows) ---
    N2 = 600
    Pin2 = jax.random.normal(jax.random.fold_in(k_pin, 1), (N2,) + data_shape, jnp.float32)
    eps2 = jax.random.normal(jax.random.fold_in(k_eps, 1), (N2, latentD), jnp.float32)
    out2 = vposer_forward(Pin2, eps2, params, num_joints=J)
    jax.block_until_ready(out2)
    _check(out2, vposer_ref(Pin2, eps2, params))

    print("KERNEL_OK")
</pallas_src>

<mosaic_0001>
module attributes {stable_mosaic.version = 11 : i64} {
  func.func @vposer_kernel(%arg0: i32, %arg1: memref<8x128xf32, #tpu.memory_space<vmem>>, %arg2: memref<8x128xf32, #tpu.memory_space<vmem>>, %arg3: memref<128x128xf32, #tpu.memory_space<vmem>>, %arg4: memref<1x128xf32, #tpu.memory_space<vmem>>, %arg5: memref<128x128xf32, #tpu.memory_space<vmem>>, %arg6: memref<1x128xf32, #tpu.memory_space<vmem>>, %arg7: memref<128x256xf32, #tpu.memory_space<vmem>>, %arg8: memref<1x256xf32, #tpu.memory_space<vmem>>, %arg9: memref<128x128xf32, #tpu.memory_space<vmem>>, %arg10: memref<1x128xf32, #tpu.memory_space<vmem>>, %arg11: memref<128x128xf32, #tpu.memory_space<vmem>>, %arg12: memref<1x128xf32, #tpu.memory_space<vmem>>, %arg13: memref<128x768xf32, #tpu.memory_space<vmem>>, %arg14: memref<1x768xf32, #tpu.memory_space<vmem>>, %arg15: memref<8x256xf32, #tpu.memory_space<vmem>>, %arg16: memref<8x1152xf32, #tpu.memory_space<vmem>>) attributes {dimension_semantics = [#tpu.dimension_semantics<parallel>], iteration_bounds = array<i64: 1>, scalar_prefetch = 0 : i64, scratch_operands = 0 : i64, tpu.core_type = #tpu.core_type<tc>, window_params = [{transform_indices = @transform_0, window_bounds = array<i64: 8, 128>}, {transform_indices = @transform_1, window_bounds = array<i64: 8, 128>}, {pipeline_mode = #tpu.pipeline_mode<synchronous>, transform_indices = @transform_2, window_bounds = array<i64: 128, 128>}, {pipeline_mode = #tpu.pipeline_mode<synchronous>, transform_indices = @transform_3, window_bounds = array<i64: 1, 128>}, {pipeline_mode = #tpu.pipeline_mode<synchronous>, transform_indices = @transform_4, window_bounds = array<i64: 128, 128>}, {pipeline_mode = #tpu.pipeline_mode<synchronous>, transform_indices = @transform_5, window_bounds = array<i64: 1, 128>}, {pipeline_mode = #tpu.pipeline_mode<synchronous>, transform_indices = @transform_6, window_bounds = array<i64: 128, 256>}, {pipeline_mode = #tpu.pipeline_mode<synchronous>, transform_indices = @transform_7, window_bounds = array<i64: 1, 256>}, {pipeline_mode = #tpu.pipeline_mode<synchronous>, transform_indices = @transform_8, window_bounds = array<i64: 128, 128>}, {pipeline_mode = #tpu.pipeline_mode<synchronous>, transform_indices = @transform_9, window_bounds = array<i64: 1, 128>}, {pipeline_mode = #tpu.pipeline_mode<synchronous>, transform_indices = @transform_10, window_bounds = array<i64: 128, 128>}, {pipeline_mode = #tpu.pipeline_mode<synchronous>, transform_indices = @transform_11, window_bounds = array<i64: 1, 128>}, {pipeline_mode = #tpu.pipeline_mode<synchronous>, transform_indices = @transform_12, window_bounds = array<i64: 128, 768>}, {pipeline_mode = #tpu.pipeline_mode<synchronous>, transform_indices = @transform_13, window_bounds = array<i64: 1, 768>}, {transform_indices = @transform_14, window_bounds = array<i64: 8, 256>}, {transform_indices = @transform_15, window_bounds = array<i64: 8, 1152>}]} {
    %c0 = arith.constant 0 : index
    %c0_0 = arith.constant 0 : index
    %0 = vector.load %arg1[%c0, %c0_0] : memref<8x128xf32, #tpu.memory_space<vmem>>, vector<8x128xf32>
    %c0_1 = arith.constant 0 : index
    %c0_2 = arith.constant 0 : index
    %1 = vector.load %arg3[%c0_1, %c0_2] : memref<128x128xf32, #tpu.memory_space<vmem>>, vector<128x128xf32>
    %cst = arith.constant dense<0.000000e+00> : vector<8x128xf32>
    %2 = tpu.matmul %0, %1, %cst {dimension_numbers = #tpu.dot_dimension_numbers<[1], [0], [0], [1], [0, 0, 1, 1], [], []>} : vector<8x128xf32>, vector<128x128xf32>, vector<8x128xf32> -> vector<8x128xf32>
    %c0_3 = arith.constant 0 : index
    %c0_4 = arith.constant 0 : index
    %3 = vector.load %arg4[%c0_3, %c0_4] : memref<1x128xf32, #tpu.memory_space<vmem>>, vector<1x128xf32>
    %4 = vector.broadcast %3 : vector<1x128xf32> to vector<8x128xf32>
    %5 = arith.addf %2, %4 : vector<8x128xf32>
    %cst_5 = arith.constant 0.000000e+00 : f32
    %6 = vector.broadcast %cst_5 : f32 to vector<8x128xf32>
    %7 = arith.cmpf oge, %5, %6 : vector<8x128xf32>
    %cst_6 = arith.constant 2.000000e-01 : f32
    %8 = vector.broadcast %cst_6 : f32 to vector<8x128xf32>
    %9 = arith.mulf %8, %5 : vector<8x128xf32>
    %10 = arith.select %7, %5, %9 : vector<8x128xi1>, vector<8x128xf32>
    %c0_7 = arith.constant 0 : index
    %c0_8 = arith.constant 0 : index
    %11 = vector.load %arg5[%c0_7, %c0_8] : memref<128x128xf32, #tpu.memory_space<vmem>>, vector<128x128xf32>
    %cst_9 = arith.constant dense<0.000000e+00> : vector<8x128xf32>
    %12 = tpu.matmul %10, %11, %cst_9 {dimension_numbers = #tpu.dot_dimension_numbers<[1], [0], [0], [1], [0, 0, 1, 1], [], []>} : vector<8x128xf32>, vector<128x128xf32>, vector<8x128xf32> -> vector<8x128xf32>
    %c0_10 = arith.constant 0 : index
    %c0_11 = arith.constant 0 : index
    %13 = vector.load %arg6[%c0_10, %c0_11] : memref<1x128xf32, #tpu.memory_space<vmem>>, vector<1x128xf32>
    %14 = vector.broadcast %13 : vector<1x128xf32> to vector<8x128xf32>
    %15 = arith.addf %12, %14 : vector<8x128xf32>
    %cst_12 = arith.constant 0.000000e+00 : f32
    %16 = vector.broadcast %cst_12 : f32 to vector<8x128xf32>
    %17 = arith.cmpf oge, %15, %16 : vector<8x128xf32>
    %cst_13 = arith.constant 2.000000e-01 : f32
    %18 = vector.broadcast %cst_13 : f32 to vector<8x128xf32>
    %19 = arith.mulf %18, %15 : vector<8x128xf32>
    %20 = arith.select %17, %15, %19 : vector<8x128xi1>, vector<8x128xf32>
    %c0_14 = arith.constant 0 : index
    %c0_15 = arith.constant 0 : index
    %21 = vector.load %arg7[%c0_14, %c0_15] : memref<128x256xf32, #tpu.memory_space<vmem>>, vector<128x256xf32>
    %cst_16 = arith.constant dense<0.000000e+00> : vector<8x256xf32>
    %22 = tpu.matmul %20, %21, %cst_16 {dimension_numbers = #tpu.dot_dimension_numbers<[1], [0], [0], [1], [0, 0, 1, 1], [], []>} : vector<8x128xf32>, vector<128x256xf32>, vector<8x256xf32> -> vector<8x256xf32>
    %c0_17 = arith.constant 0 : index
    %c0_18 = arith.constant 0 : index
    %23 = vector.load %arg8[%c0_17, %c0_18] : memref<1x256xf32, #tpu.memory_space<vmem>>, vector<1x256xf32>
    %24 = vector.broadcast %23 : vector<1x256xf32> to vector<8x256xf32>
    %25 = arith.addf %22, %24 : vector<8x256xf32>
    %26 = vector.extract_strided_slice %25 {offsets = [0, 0], sizes = [8, 128], strides = [1, 1]} : vector<8x256xf32> to vector<8x128xf32>
    %27 = vector.extract_strided_slice %25 {offsets = [0, 128], sizes = [8, 128], strides = [1, 1]} : vector<8x256xf32> to vector<8x128xf32>
    %cst_19 = arith.constant 0.000000e+00 : f32
    %28 = vector.broadcast %cst_19 : f32 to vector<8x128xf32>
    %29 = arith.maximumf %27, %28 : vector<8x128xf32>
    %30 = math.absf %27 : vector<8x128xf32>
    %cst_20 = arith.constant 0.000000e+00 : f32
    %31 = vector.broadcast %cst_20 : f32 to vector<8x128xf32>
    %32 = arith.subf %31, %30 : vector<8x128xf32>
    %33 = math.exp %32 : vector<8x128xf32>
    %34 = math.log1p %33 : vector<8x128xf32>
    %35 = arith.addf %29, %34 : vector<8x128xf32>
    %c0_21 = arith.constant 0 : index
    %c0_22 = arith.constant 0 : index
    %36 = vector.load %arg15[%c0_21, %c0_22] : memref<8x256xf32, #tpu.memory_space<vmem>>, vector<8x128xf32>
    tpu.vector_store %arg15[%c0_21, %c0_22], %26 {strides = array<i32>} : memref<8x256xf32, #tpu.memory_space<vmem>>, vector<8x128xf32>,
    %c0_23 = arith.constant 0 : index
    %c128 = arith.constant 128 : index
    %37 = vector.load %arg15[%c0_23, %c128] : memref<8x256xf32, #tpu.memory_space<vmem>>, vector<8x128xf32>
    tpu.vector_store %arg15[%c0_23, %c128], %35 {strides = array<i32>} : memref<8x256xf32, #tpu.memory_space<vmem>>, vector<8x128xf32>,
    %c0_24 = arith.constant 0 : index
    %c0_25 = arith.constant 0 : index
    %38 = vector.load %arg2[%c0_24, %c0_25] : memref<8x128xf32, #tpu.memory_space<vmem>>, vector<8x128xf32>
    %39 = arith.mulf %35, %38 : vector<8x128xf32>
    %40 = arith.addf %26, %39 : vector<8x128xf32>
    %c0_26 = arith.constant 0 : index
    %c0_27 = arith.constant 0 : index
    %41 = vector.load %arg9[%c0_26, %c0_27] : memref<128x128xf32, #tpu.memory_space<vmem>>, vector<128x128xf32>
    %cst_28 = arith.constant dense<0.000000e+00> : vector<8x128xf32>
    %42 = tpu.matmul %40, %41, %cst_28 {dimension_numbers = #tpu.dot_dimension_numbers<[1], [0], [0], [1], [0, 0, 1, 1], [], []>} : vector<8x128xf32>, vector<128x128xf32>, vector<8x128xf32> -> vector<8x128xf32>
    %c0_29 = arith.constant 0 : index
    %c0_30 = arith.constant 0 : index
    %43 = vector.load %arg10[%c0_29, %c0_30] : memref<1x128xf32, #tpu.memory_space<vmem>>, vector<1x128xf32>
    %44 = vector.broadcast %43 : vector<1x128xf32> to vector<8x128xf32>
    %45 = arith.addf %42, %44 : vector<8x128xf32>
    %cst_31 = arith.constant 0.000000e+00 : f32
    %46 = vector.broadcast %cst_31 : f32 to vector<8x128xf32>
    %47 = arith.cmpf oge, %45, %46 : vector<8x128xf32>
    %cst_32 = arith.constant 2.000000e-01 : f32
    %48 = vector.broadcast %cst_32 : f32 to vector<8x128xf32>
    %49 = arith.mulf %48, %45 : vector<8x128xf32>
    %50 = arith.select %47, %45, %49 : vector<8x128xi1>, vector<8x128xf32>
    %c0_33 = arith.constant 0 : index
    %c0_34 = arith.constant 0 : index
    %51 = vector.load %arg11[%c0_33, %c0_34] : memref<128x128xf32, #tpu.memory_space<vmem>>, vector<128x128xf32>
    %cst_35 = arith.constant dense<0.000000e+00> : vector<8x128xf32>
    %52 = tpu.matmul %50, %51, %cst_35 {dimension_numbers = #tpu.dot_dimension_numbers<[1], [0], [0], [1], [0, 0, 1, 1], [], []>} : vector<8x128xf32>, vector<128x128xf32>, vector<8x128xf32> -> vector<8x128xf32>
    %c0_36 = arith.constant 0 : index
    %c0_37 = arith.constant 0 : index
    %53 = vector.load %arg12[%c0_36, %c0_37] : memref<1x128xf32, #tpu.memory_space<vmem>>, vector<1x128xf32>
    %54 = vector.broadcast %53 : vector<1x128xf32> to vector<8x128xf32>
    %55 = arith.addf %52, %54 : vector<8x128xf32>
    %cst_38 = arith.constant 0.000000e+00 : f32
    %56 = vector.broadcast %cst_38 : f32 to vector<8x128xf32>
    %57 = arith.cmpf oge, %55, %56 : vector<8x128xf32>
    %cst_39 = arith.constant 2.000000e-01 : f32
    %58 = vector.broadcast %cst_39 : f32 to vector<8x128xf32>
    %59 = arith.mulf %58, %55 : vector<8x128xf32>
    %60 = arith.select %57, %55, %59 : vector<8x128xi1>, vector<8x128xf32>
    %c0_40 = arith.constant 0 : index
    %c0_41 = arith.constant 0 : index
    %61 = vector.load %arg13[%c0_40, %c0_41] : memref<128x768xf32, #tpu.memory_space<vmem>>, vector<128x768xf32>
    %cst_42 = arith.constant dense<0.000000e+00> : vector<8x768xf32>
    %62 = tpu.matmul %60, %61, %cst_42 {dimension_numbers = #tpu.dot_dimension_numbers<[1], [0], [0], [1], [0, 0, 1, 1], [], []>} : vector<8x128xf32>, vector<128x768xf32>, vector<8x768xf32> -> vector<8x768xf32>
    %c0_43 = arith.constant 0 : index
    %c0_44 = arith.constant 0 : index
    %63 = vector.load %arg14[%c0_43, %c0_44] : memref<1x768xf32, #tpu.memory_space<vmem>>, vector<1x768xf32>
    %64 = vector.broadcast %63 : vector<1x768xf32> to vector<8x768xf32>
    %65 = arith.addf %62, %64 : vector<8x768xf32>
    %66 = vector.extract_strided_slice %65 {offsets = [0, 0], sizes = [8, 128], strides = [1, 1]} : vector<8x768xf32> to vector<8x128xf32>
    %67 = vector.extract_strided_slice %65 {offsets = [0, 128], sizes = [8, 128], strides = [1, 1]} : vector<8x768xf32> to vector<8x128xf32>
    %68 = vector.extract_strided_slice %65 {offsets = [0, 256], sizes = [8, 128], strides = [1, 1]} : vector<8x768xf32> to vector<8x128xf32>
    %69 = vector.extract_strided_slice %65 {offsets = [0, 384], sizes = [8, 128], strides = [1, 1]} : vector<8x768xf32> to vector<8x128xf32>
    %70 = vector.extract_strided_slice %65 {offsets = [0, 512], sizes = [8, 128], strides = [1, 1]} : vector<8x768xf32> to vector<8x128xf32>
    %71 = vector.extract_strided_slice %65 {offsets = [0, 640], sizes = [8, 128], strides = [1, 1]} : vector<8x768xf32> to vector<8x128xf32>
    %72 = arith.mulf %66, %66 : vector<8x128xf32>
    %73 = arith.mulf %68, %68 : vector<8x128xf32>
    %74 = arith.addf %72, %73 : vector<8x128xf32>
    %75 = arith.mulf %70, %70 : vector<8x128xf32>
    %76 = arith.addf %74, %75 : vector<8x128xf32>
    %cst_45 = arith.constant 1.000000e-24 : f32
    %77 = vector.broadcast %cst_45 : f32 to vector<8x128xf32>
    %78 = arith.maximumf %76, %77 : vector<8x128xf32>
    %79 = math.rsqrt %78 : vector<8x128xf32>
    %80 = arith.mulf %66, %79 : vector<8x128xf32>
    %81 = arith.mulf %68, %79 : vector<8x128xf32>
    %82 = arith.mulf %70, %79 : vector<8x128xf32>
    %c0_46 = arith.constant 0 : index
    %c0_47 = arith.constant 0 : index
    %83 = vector.load %arg16[%c0_46, %c0_47] : memref<8x1152xf32, #tpu.memory_space<vmem>>, vector<8x128xf32>
    tpu.vector_store %arg16[%c0_46, %c0_47], %80 {strides = array<i32>} : memref<8x1152xf32, #tpu.memory_space<vmem>>, vector<8x128xf32>,
    %c0_48 = arith.constant 0 : index
    %c384 = arith.constant 384 : index
    %84 = vector.load %arg16[%c0_48, %c384] : memref<8x1152xf32, #tpu.memory_space<vmem>>, vector<8x128xf32>
    tpu.vector_store %arg16[%c0_48, %c384], %81 {strides = array<i32>} : memref<8x1152xf32, #tpu.memory_space<vmem>>, vector<8x128xf32>,
    %c0_49 = arith.constant 0 : index
    %c768 = arith.constant 768 : index
    %85 = vector.load %arg16[%c0_49, %c768] : memref<8x1152xf32, #tpu.memory_space<vmem>>, vector<8x128xf32>
    tpu.vector_store %arg16[%c0_49, %c768], %82 {strides = array<i32>} : memref<8x1152xf32, #tpu.memory_space<vmem>>, vector<8x128xf32>,
    %86 = arith.mulf %80, %67 : vector<8x128xf32>
    %87 = arith.mulf %81, %69 : vector<8x128xf32>
    %88 = arith.addf %86, %87 : vector<8x128xf32>
    %89 = arith.mulf %82, %71 : vector<8x128xf32>
    %90 = arith.addf %88, %89 : vector<8x128xf32>
    %91 = arith.mulf %90, %80 : vector<8x128xf32>
    %92 = arith.subf %67, %91 : vector<8x128xf32>
    %93 = arith.mulf %90, %81 : vector<8x128xf32>
    %94 = arith.subf %69, %93 : vector<8x128xf32>
    %95 = arith.mulf %90, %82 : vector<8x128xf32>
    %96 = arith.subf %71, %95 : vector<8x128xf32>
    %97 = arith.mulf %92, %92 : vector<8x128xf32>
    %98 = arith.mulf %94, %94 : vector<8x128xf32>
    %99 = arith.addf %97, %98 : vector<8x128xf32>
    %100 = arith.mulf %96, %96 : vector<8x128xf32>
    %101 = arith.addf %99, %100 : vector<8x128xf32>
    %cst_50 = arith.constant 1.000000e-24 : f32
    %102 = vector.broadcast %cst_50 : f32 to vector<8x128xf32>
    %103 = arith.maximumf %101, %102 : vector<8x128xf32>
    %104 = math.rsqrt %103 : vector<8x128xf32>
    %105 = arith.mulf %92, %104 : vector<8x128xf32>
    %106 = arith.mulf %94, %104 : vector<8x128xf32>
    %107 = arith.mulf %96, %104 : vector<8x128xf32>
    %c0_51 = arith.constant 0 : index
    %c128_52 = arith.constant 128 : index
    %108 = vector.load %arg16[%c0_51, %c128_52] : memref<8x1152xf32, #tpu.memory_space<vmem>>, vector<8x128xf32>
    tpu.vector_store %arg16[%c0_51, %c128_52], %105 {strides = array<i32>} : memref<8x1152xf32, #tpu.memory_space<vmem>>, vector<8x128xf32>,
    %c0_53 = arith.constant 0 : index
    %c512 = arith.constant 512 : index
    %109 = vector.load %arg16[%c0_53, %c512] : memref<8x1152xf32, #tpu.memory_space<vmem>>, vector<8x128xf32>
    tpu.vector_store %arg16[%c0_53, %c512], %106 {strides = array<i32>} : memref<8x1152xf32, #tpu.memory_space<vmem>>, vector<8x128xf32>,
    %c0_54 = arith.constant 0 : index
    %c896 = arith.constant 896 : index
    %110 = vector.load %arg16[%c0_54, %c896] : memref<8x1152xf32, #tpu.memory_space<vmem>>, vector<8x128xf32>
    tpu.vector_store %arg16[%c0_54, %c896], %107 {strides = array<i32>} : memref<8x1152xf32, #tpu.memory_space<vmem>>, vector<8x128xf32>,
    %111 = arith.mulf %81, %107 : vector<8x128xf32>
    %112 = arith.mulf %82, %106 : vector<8x128xf32>
    %113 = arith.subf %111, %112 : vector<8x128xf32>
    %c0_55 = arith.constant 0 : index
    %c256 = arith.constant 256 : index
    %114 = vector.load %arg16[%c0_55, %c256] : memref<8x1152xf32, #tpu.memory_space<vmem>>, vector<8x128xf32>
    tpu.vector_store %arg16[%c0_55, %c256], %113 {strides = array<i32>} : memref<8x1152xf32, #tpu.memory_space<vmem>>, vector<8x128xf32>,
    %115 = arith.mulf %82, %105 : vector<8x128xf32>
    %116 = arith.mulf %80, %107 : vector<8x128xf32>
    %117 = arith.subf %115, %116 : vector<8x128xf32>
    %c0_56 = arith.constant 0 : index
    %c640 = arith.constant 640 : index
    %118 = vector.load %arg16[%c0_56, %c640] : memref<8x1152xf32, #tpu.memory_space<vmem>>, vector<8x128xf32>
    tpu.vector_store %arg16[%c0_56, %c640], %117 {strides = array<i32>} : memref<8x1152xf32, #tpu.memory_space<vmem>>, vector<8x128xf32>,
    %119 = arith.mulf %80, %106 : vector<8x128xf32>
    %120 = arith.mulf %81, %105 : vector<8x128xf32>
    %121 = arith.subf %119, %120 : vector<8x128xf32>
    %c0_57 = arith.constant 0 : index
    %c1024 = arith.constant 1024 : index
    %122 = vector.load %arg16[%c0_57, %c1024] : memref<8x1152xf32, #tpu.memory_space<vmem>>, vector<8x128xf32>
    tpu.vector_store %arg16[%c0_57, %c1024], %121 {strides = array<i32>} : memref<8x1152xf32, #tpu.memory_space<vmem>>, vector<8x128xf32>,
    return
  }
  func.func @transform_0(%arg0: i32) -> (i32, i32) {
    %c0_i32 = arith.constant 0 : i32
    %c0_i32_0 = arith.constant 0 : i32
    return %arg0, %c0_i32 : i32, i32
  }
  func.func @transform_1(%arg0: i32) -> (i32, i32) {
    %c0_i32 = arith.constant 0 : i32
    %c0_i32_0 = arith.constant 0 : i32
    return %arg0, %c0_i32 : i32, i32
  }
  func.func @transform_2(%arg0: i32) -> (i32, i32) {
    %c0_i32 = arith.constant 0 : i32
    %c0_i32_0 = arith.constant 0 : i32
    %c0_i32_1 = arith.constant 0 : i32
    return %c0_i32, %c0_i32_0 : i32, i32
  }
  func.func @transform_3(%arg0: i32) -> (i32, i32) {
    %c0_i32 = arith.constant 0 : i32
    %c0_i32_0 = arith.constant 0 : i32
    %c0_i32_1 = arith.constant 0 : i32
    return %c0_i32, %c0_i32_0 : i32, i32
  }
  func.func @transform_4(%arg0: i32) -> (i32, i32) {
    %c0_i32 = arith.constant 0 : i32
    %c0_i32_0 = arith.constant 0 : i32
    %c0_i32_1 = arith.constant 0 : i32
    return %c0_i32, %c0_i32_0 : i32, i32
  }
  func.func @transform_5(%arg0: i32) -> (i32, i32) {
    %c0_i32 = arith.constant 0 : i32
    %c0_i32_0 = arith.constant 0 : i32
    %c0_i32_1 = arith.constant 0 : i32
    return %c0_i32, %c0_i32_0 : i32, i32
  }
  func.func @transform_6(%arg0: i32) -> (i32, i32) {
    %c0_i32 = arith.constant 0 : i32
    %c0_i32_0 = arith.constant 0 : i32
    %c0_i32_1 = arith.constant 0 : i32
    return %c0_i32, %c0_i32_0 : i32, i32
  }
  func.func @transform_7(%arg0: i32) -> (i32, i32) {
    %c0_i32 = arith.constant 0 : i32
    %c0_i32_0 = arith.constant 0 : i32
    %c0_i32_1 = arith.constant 0 : i32
    return %c0_i32, %c0_i32_0 : i32, i32
  }
  func.func @transform_8(%arg0: i32) -> (i32, i32) {
    %c0_i32 = arith.constant 0 : i32
    %c0_i32_0 = arith.constant 0 : i32
    %c0_i32_1 = arith.constant 0 : i32
    return %c0_i32, %c0_i32_0 : i32, i32
  }
  func.func @transform_9(%arg0: i32) -> (i32, i32) {
    %c0_i32 = arith.constant 0 : i32
    %c0_i32_0 = arith.constant 0 : i32
    %c0_i32_1 = arith.constant 0 : i32
    return %c0_i32, %c0_i32_0 : i32, i32
  }
  func.func @transform_10(%arg0: i32) -> (i32, i32) {
    %c0_i32 = arith.constant 0 : i32
    %c0_i32_0 = arith.constant 0 : i32
    %c0_i32_1 = arith.constant 0 : i32
    return %c0_i32, %c0_i32_0 : i32, i32
  }
  func.func @transform_11(%arg0: i32) -> (i32, i32) {
    %c0_i32 = arith.constant 0 : i32
    %c0_i32_0 = arith.constant 0 : i32
    %c0_i32_1 = arith.constant 0 : i32
    return %c0_i32, %c0_i32_0 : i32, i32
  }
  func.func @transform_12(%arg0: i32) -> (i32, i32) {
    %c0_i32 = arith.constant 0 : i32
    %c0_i32_0 = arith.constant 0 : i32
    %c0_i32_1 = arith.constant 0 : i32
    return %c0_i32, %c0_i32_0 : i32, i32
  }
  func.func @transform_13(%arg0: i32) -> (i32, i32) {
    %c0_i32 = arith.constant 0 : i32
    %c0_i32_0 = arith.constant 0 : i32
    %c0_i32_1 = arith.constant 0 : i32
    return %c0_i32, %c0_i32_0 : i32, i32
  }
  func.func @transform_14(%arg0: i32) -> (i32, i32) {
    %c0_i32 = arith.constant 0 : i32
    %c0_i32_0 = arith.constant 0 : i32
    return %arg0, %c0_i32 : i32, i32
  }
  func.func @transform_15(%arg0: i32) -> (i32, i32) {
    %c0_i32 = arith.constant 0 : i32
    %c0_i32_0 = arith.constant 0 : i32
    return %arg0, %c0_i32 : i32, i32
  }
}

</mosaic_0001>

<bundles_post_ra>
// kernel: vposer_forward.1
= control target key start
LH: loop header
LB: loop body
LE: loop exit
PB: predicated region body
PF: predicated region fallthrough
CT: control target
= control target key end

     0   :  { %v1189_v0 = vmov 0.0   ;;  %vm1190_vm0 = vmmov 0   ;;  %s2001_s2 = inlined_call_operand.vmem [shape: f32[128,128], index: 2, kind: input, shape index: {}]   ;;  %s2002_s4 = inlined_call_operand.vmem [shape: f32[128,128], index: 4, kind: input, shape index: {}]   ;;  %s2003_s0 = inlined_call_operand.vmem [shape: f32[8,128], index: 0, kind: input, shape index: {}]   ;;  %s2004_s6 = inlined_call_operand.vmem [shape: f32[128,256], index: 6, kind: input, shape index: {}]   ;;  %s2005_s3 = inlined_call_operand.vmem [shape: f32[1,128], index: 3, kind: input, shape index: {}]   ;;  %s2006_s5 = inlined_call_operand.vmem [shape: f32[1,128], index: 5, kind: input, shape index: {}]   ;;  %s2007_s8 = inlined_call_operand.vmem [shape: f32[128,128], index: 8, kind: input, shape index: {}]   ;;  %s2008_s10 = inlined_call_operand.vmem [shape: f32[128,128], index: 10, kind: input, shape index: {}]   ;;  %s2009_s7 = inlined_call_operand.vmem [shape: f32[1,256], index: 7, kind: input, shape index: {}]   ;;  %s2010_s14 = inlined_call_operand.vmem [shape: f32[8,256], index: 14, kind: output, shape index: {0}]   ;;  %s2011_s1 = inlined_call_operand.vmem [shape: f32[8,128], index: 1, kind: input, shape index: {}]   ;;  %s2012_s12 = inlined_call_operand.vmem [shape: f32[128,768], index: 12, kind: input, shape index: {}]   ;;  %s2013_s9 = inlined_call_operand.vmem [shape: f32[1,128], index: 9, kind: input, shape index: {}]   ;;  %s2014_s11 = inlined_call_operand.vmem [shape: f32[1,128], index: 11, kind: input, shape index: {}]   ;;  %s2015_s13 = inlined_call_operand.vmem [shape: f32[1,768], index: 13, kind: input, shape index: {}]   ;;  %s2016_s15 = inlined_call_operand.vmem [shape: f32[8,1152], index: 15, kind: output, shape index: {1}]  }
   0x1   :  { %1039 = vmatprep.subr.mxu0 %v1189_v0  ;;  %v65_v1 = vld [vmem:[%s2001_s2 + $0x78] sm:$0xff]  ;;  %v64_v2 = vld [vmem:[%s2001_s2 + $0x70] sm:$0xff]  ;;  %1071 = vmatprep.mubr.msk.f32.mxu0 %vm1190_vm0, %v1189_v0  ;;  %v63_v3 = vld [vmem:[%s2001_s2 + $0x68] sm:$0xff] }
   0x2   :  { %1040 = vmatpush3.msra.mxu0 %v65_v1  ;;  %1074 = vmatprep.subr.mxu1 %v1189_v0  ;;  %v62_v4 = vld [vmem:[%s2001_s2 + $0x60] sm:$0xff]  ;;  %v161_v5 = vld [vmem:[%s2002_s4 + $0x78] sm:$0xff]  ;;  %v160_v7 = vld [vmem:[%s2002_s4 + $0x70] sm:$0xff] }
   0x3   :  { %1041 = vmatprep.subr.mxu0 %v1189_v0  ;;  %1106 = vmatprep.mubr.msk.f32.mxu1 %vm1190_vm0, %v1189_v0  ;;  %v61_v6 = vld [vmem:[%s2001_s2 + $0x58] sm:$0xff]  ;;  %v159_v8 = vld [vmem:[%s2002_s4 + $0x68] sm:$0xff]  ;;  %v60_v9 = vld [vmem:[%s2001_s2 + $0x50] sm:$0xff] }
   0x4   :  { %1042 = vmatpush3.msra.mxu0 %v64_v2  ;;  %1075 = vmatpush3.msra.mxu1 %v161_v5  ;;  %v158_v10 = vld [vmem:[%s2002_s4 + $0x60] sm:$0xff]  ;;  %v59_v11 = vld [vmem:[%s2001_s2 + $0x48] sm:$0xff]  ;;  %v157_v12 = vld [vmem:[%s2002_s4 + $0x58] sm:$0xff] }
   0x5   :  { %1043 = vmatprep.subr.mxu0 %v1189_v0  ;;  %1076 = vmatprep.subr.mxu1 %v1189_v0  ;;  %v58_v13 = vld [vmem:[%s2001_s2 + $0x40] sm:$0xff]  ;;  %v156_v14 = vld [vmem:[%s2002_s4 + $0x50] sm:$0xff]  ;;  %v57_v15 = vld [vmem:[%s2001_s2 + $0x38] sm:$0xff] }
   0x6   :  { %1044 = vmatpush3.msra.mxu0 %v63_v3  ;;  %1077 = vmatpush3.msra.mxu1 %v160_v7  ;;  %v155_v16 = vld [vmem:[%s2002_s4 + $0x48] sm:$0xff]  ;;  %v56_v17 = vld [vmem:[%s2001_s2 + $0x30] sm:$0xff]  ;;  %v154_v18 = vld [vmem:[%s2002_s4 + $0x40] sm:$0xff] }
   0x7   :  { %1045 = vmatprep.subr.mxu0 %v1189_v0  ;;  %1078 = vmatprep.subr.mxu1 %v1189_v0  ;;  %v55_v19 = vld [vmem:[%s2001_s2 + $0x28] sm:$0xff]  ;;  %v153_v20 = vld [vmem:[%s2002_s4 + $0x38] sm:$0xff]  ;;  %v54_v21 = vld [vmem:[%s2001_s2 + $0x20] sm:$0xff] }
   0x8   :  { %1046 = vmatpush3.msra.mxu0 %v62_v4  ;;  %1079 = vmatpush3.msra.mxu1 %v159_v8  ;;  %v152_v22 = vld [vmem:[%s2002_s4 + $0x30] sm:$0xff]  ;;  %v53_v23 = vld [vmem:[%s2001_s2 + $0x18] sm:$0xff]  ;;  %v151_v24 = vld [vmem:[%s2002_s4 + $0x28] sm:$0xff] }
   0x9   :  { %1047 = vmatprep.subr.mxu0 %v1189_v0  ;;  %1080 = vmatprep.subr.mxu1 %v1189_v0  ;;  %v52_v25 = vld [vmem:[%s2001_s2 + $0x10] sm:$0xff]  ;;  %v150_v26 = vld [vmem:[%s2002_s4 + $0x20] sm:$0xff]  ;;  %v51_v27 = vld [vmem:[%s2001_s2 + $0x8] sm:$0xff] }
   0xa   :  { %1048 = vmatpush3.msra.mxu0 %v61_v6  ;;  %1081 = vmatpush3.msra.mxu1 %v158_v10  ;;  %v149_v28 = vld [vmem:[%s2002_s4 + $0x18] sm:$0xff]  ;;  %v50_v29 = vld [vmem:[%s2001_s2] sm:$0xff]  ;;  %v148_v31 = vld [vmem:[%s2002_s4 + $0x10] sm:$0xff] }
   0xb   :  { %1049 = vmatprep.subr.mxu0 %v1189_v0  ;;  %1082 = vmatprep.subr.mxu1 %v1189_v0  ;;  %v49_v30 = vld [vmem:[%s2003_s0] sm:$0xff]  ;;  %v147_v32 = vld [vmem:[%s2002_s4 + $0x8] sm:$0xff]  ;;  %v273_v34 = vld [vmem:[%s2004_s6 + $0xf8] sm:$0xff] }
   0xc   :  { %1050 = vmatpush3.msra.mxu0 %v60_v9  ;;  %1083 = vmatpush3.msra.mxu1 %v157_v12  ;;  %v146_v33 = vld [vmem:[%s2002_s4] sm:$0xff]  ;;  %v272_v35 = vld [vmem:[%s2004_s6 + $0xf0] sm:$0xff]  ;;  %v271_v36 = vld [vmem:[%s2004_s6 + $0xe8] sm:$0xff] }
   0xd   :  { %1051 = vmatprep.subr.mxu0 %v1189_v0  ;;  %1084 = vmatprep.subr.mxu1 %v1189_v0  ;;  %v270_v37 = vld [vmem:[%s2004_s6 + $0xe0] sm:$0xff]  ;;  %v269_v38 = vld [vmem:[%s2004_s6 + $0xd8] sm:$0xff]  ;;  %v268_v39 = vld [vmem:[%s2004_s6 + $0xd0] sm:$0xff] }
   0xe   :  { %1052 = vmatpush3.msra.mxu0 %v59_v11  ;;  %1085 = vmatpush3.msra.mxu1 %v156_v14  ;;  %v267_v40 = vld [vmem:[%s2004_s6 + $0xc8] sm:$0xff]  ;;  %v266_v41 = vld [vmem:[%s2004_s6 + $0xc0] sm:$0xff]  ;;  %v265_v42 = vld [vmem:[%s2004_s6 + $0xb8] sm:$0xff] }
   0xf   :  { %1053 = vmatprep.subr.mxu0 %v1189_v0  ;;  %1086 = vmatprep.subr.mxu1 %v1189_v0  ;;  %v264_v43 = vld [vmem:[%s2004_s6 + $0xb0] sm:$0xff]  ;;  %v263_v44 = vld [vmem:[%s2004_s6 + $0xa8] sm:$0xff]  ;;  %v262_v45 = vld [vmem:[%s2004_s6 + $0xa0] sm:$0xff] }
  0x10   :  { %1054 = vmatpush3.msra.mxu0 %v58_v13  ;;  %1087 = vmatpush3.msra.mxu1 %v155_v16  ;;  %v261_v46 = vld [vmem:[%s2004_s6 + $0x98] sm:$0xff]  ;;  %v260_v47 = vld [vmem:[%s2004_s6 + $0x90] sm:$0xff]  ;;  %v259_v48 = vld [vmem:[%s2004_s6 + $0x88] sm:$0xff] }
  0x11   :  { %1055 = vmatprep.subr.mxu0 %v1189_v0  ;;  %1088 = vmatprep.subr.mxu1 %v1189_v0  ;;  %v258_v49 = vld [vmem:[%s2004_s6 + $0x80] sm:$0xff]  ;;  %v257_v50 = vld [vmem:[%s2004_s6 + $0x78] sm:$0xff]  ;;  %v256_v51 = vld [vmem:[%s2004_s6 + $0x70] sm:$0xff] }
  0x12   :  { %1056 = vmatpush3.msra.mxu0 %v57_v15  ;;  %1089 = vmatpush3.msra.mxu1 %v154_v18  ;;  %v255_v52 = vld [vmem:[%s2004_s6 + $0x68] sm:$0xff]  ;;  %v254_v53 = vld [vmem:[%s2004_s6 + $0x60] sm:$0xff]  ;;  %v253_v54 = vld [vmem:[%s2004_s6 + $0x58] sm:$0xff] }
  0x13   :  { %1057 = vmatprep.subr.mxu0 %v1189_v0  ;;  %1090 = vmatprep.subr.mxu1 %v1189_v0  ;;  %v252_v55 = vld [vmem:[%s2004_s6 + $0x50] sm:$0xff]  ;;  %v251_v56 = vld [vmem:[%s2004_s6 + $0x48] sm:$0xff]  ;;  %v250_v57 = vld [vmem:[%s2004_s6 + $0x40] sm:$0xff] }
  0x14   :  { %1058 = vmatpush3.msra.mxu0 %v56_v17  ;;  %1091 = vmatpush3.msra.mxu1 %v153_v20  ;;  %v249_v58 = vld [vmem:[%s2004_s6 + $0x38] sm:$0xff]  ;;  %v248_v59 = vld [vmem:[%s2004_s6 + $0x30] sm:$0xff]  ;;  %v967_v60 = vld [vmem:[%s2005_s3] ss:$0 sm:$0xff] }
  0x15   :  { %1059 = vmatprep.subr.mxu0 %v1189_v0  ;;  %1092 = vmatprep.subr.mxu1 %v1189_v0  ;;  %v247_v3 = vld [vmem:[%s2004_s6 + $0x28] sm:$0xff]  ;;  %v246_v4 = vld [vmem:[%s2004_s6 + $0x20] sm:$0xff]  ;;  %v245_v5 = vld [vmem:[%s2004_s6 + $0x18] sm:$0xff] }
  0x16   :  { %1060 = vmatpush3.msra.mxu0 %v55_v19  ;;  %1093 = vmatpush3.msra.mxu1 %v152_v22  ;;  %v244_v6 = vld [vmem:[%s2004_s6 + $0x10] sm:$0xff]  ;;  %v243_v7 = vld [vmem:[%s2004_s6 + $0x8] sm:$0xff]  ;;  %v242_v8 = vld [vmem:[%s2004_s6] sm:$0xff] }
  0x17   :  { %1061 = vmatprep.subr.mxu0 %v1189_v0  ;;  %1094 = vmatprep.subr.mxu1 %v1189_v0  ;;  %v968_v9 = vld [vmem:[%s2006_s5] ss:$0 sm:$0xff]  ;;  %v392_v15 = vld [vmem:[%s2007_s8 + $0x78] sm:$0xff]  ;;  %v391_v16 = vld [vmem:[%s2007_s8 + $0x70] sm:$0xff] }
  0x18   :  { %1062 = vmatpush3.msra.mxu0 %v54_v21  ;;  %1095 = vmatpush3.msra.mxu1 %v151_v24  ;;  %v390_v17 = vld [vmem:[%s2007_s8 + $0x68] sm:$0xff]  ;;  %v389_v18 = vld [vmem:[%s2007_s8 + $0x60] sm:$0xff]  ;;  %v388_v19 = vld [vmem:[%s2007_s8 + $0x58] sm:$0xff] }
  0x19   :  { %1063 = vmatprep.subr.mxu0 %v1189_v0  ;;  %1096 = vmatprep.subr.mxu1 %v1189_v0  ;;  %v387_v20 = vld [vmem:[%s2007_s8 + $0x50] sm:$0xff]  ;;  %v386_v21 = vld [vmem:[%s2007_s8 + $0x48] sm:$0xff]  ;;  %v385_v22 = vld [vmem:[%s2007_s8 + $0x40] sm:$0xff] }
  0x1a   :  { %1064 = vmatpush3.msra.mxu0 %v53_v23  ;;  %1097 = vmatpush3.msra.mxu1 %v150_v26  ;;  %v384_v23 = vld [vmem:[%s2007_s8 + $0x38] sm:$0xff]  ;;  %v383_v24 = vld [vmem:[%s2007_s8 + $0x30] sm:$0xff]  ;;  %v381_v26 = vld [vmem:[%s2007_s8 + $0x20] sm:$0xff] }
  0x1b   :  { %1065 = vmatprep.subr.mxu0 %v1189_v0  ;;  %1098 = vmatprep.subr.mxu1 %v1189_v0 }
  0x1c   :  { %1066 = vmatpush3.msra.mxu0 %v52_v25  ;;  %1099 = vmatpush3.msra.mxu1 %v149_v28  ;;  %v382_v25 = vld [vmem:[%s2007_s8 + $0x28] sm:$0xff]  ;;  %v379_v28 = vld [vmem:[%s2007_s8 + $0x10] sm:$0xff] }
  0x1d   :  { %1067 = vmatprep.subr.mxu0 %v1189_v0  ;;  %1100 = vmatprep.subr.mxu1 %v1189_v0 }
  0x1e   :  { %1068 = vmatpush3.msra.mxu0 %v51_v27  ;;  %1101 = vmatpush3.msra.mxu1 %v148_v31  ;;  %v380_v27 = vld [vmem:[%s2007_s8 + $0x18] sm:$0xff] }
  0x1f   :  { %1069 = vmatprep.subr.mxu0 %v1189_v0  ;;  %1102 = vmatprep.subr.mxu1 %v1189_v0  ;;  %v488_v31 = vld [vmem:[%s2008_s10 + $0x78] sm:$0xff] }
  0x20   :  { %1070 = vmatpush3.msra.mxu0 %v50_v29  ;;  %1103 = vmatpush3.msra.mxu1 %v147_v32  ;;  %v378_v29 = vld [vmem:[%s2007_s8 + $0x8] sm:$0xff]  ;;  %v487_v32 = vld [vmem:[%s2008_s10 + $0x70] sm:$0xff] }
  0x21   :  { %1072 = vmatmul.mubr.f32.vlgmr.msra.gmra.mxu0 %v49_v30  ;;  %1104 = vmatprep.subr.mxu1 %v1189_v0  ;;  %v377_v30 = vld [vmem:[%s2007_s8] sm:$0xff] }
  0x22   :  { %350 = vmatprep.mubr.f32.mxu0 %v1189_v0  ;;  %1105 = vmatpush3.msra.mxu1 %v146_v33  ;;  %v486_v33 = vld [vmem:[%s2008_s10 + $0x68] sm:$0xff] }
  0x23   :  { %1109 = vmatprep.subr.mxu1 %v1189_v0  ;;  %286 = vmatprep.subr.mxu0 %v273_v34  ;;  %v485_v34 = vld [vmem:[%s2008_s10 + $0x60] sm:$0xff] }
  0x24   :  { %287 = vmatpush1.msra.mxu0 %v272_v35  ;;  %v484_v35 = vld [vmem:[%s2008_s10 + $0x58] sm:$0xff] }
  0x25   :  { %288 = vmatprep.subr.mxu0 %v271_v36  ;;  %v483_v36 = vld [vmem:[%s2008_s10 + $0x50] sm:$0xff] }
  0x26   :  { %289 = vmatpush1.msra.mxu0 %v270_v37  ;;  %v482_v37 = vld [vmem:[%s2008_s10 + $0x48] sm:$0xff] }
  0x27   :  { %290 = vmatprep.subr.mxu0 %v269_v38  ;;  %v481_v38 = vld [vmem:[%s2008_s10 + $0x40] sm:$0xff] }
  0x28   :  { %291 = vmatpush1.msra.mxu0 %v268_v39  ;;  %v480_v39 = vld [vmem:[%s2008_s10 + $0x38] sm:$0xff] }
  0x29   :  { %292 = vmatprep.subr.mxu0 %v267_v40  ;;  %v479_v40 = vld [vmem:[%s2008_s10 + $0x30] sm:$0xff] }
  0x2a   :  { %293 = vmatpush1.msra.mxu0 %v266_v41  ;;  %v478_v41 = vld [vmem:[%s2008_s10 + $0x28] sm:$0xff] }
  0x2b   :  { %294 = vmatprep.subr.mxu0 %v265_v42  ;;  %v477_v42 = vld [vmem:[%s2008_s10 + $0x20] sm:$0xff] }
  0x2c   :  { %295 = vmatpush1.msra.mxu0 %v264_v43  ;;  %v476_v43 = vld [vmem:[%s2008_s10 + $0x18] sm:$0xff] }
  0x2d   :  { %296 = vmatprep.subr.mxu0 %v263_v44  ;;  %v276_v44 = vlaneseq }
  0x2e   :  { %297 = vmatpush1.msra.mxu0 %v262_v45 }
  0x2f   :  { %298 = vmatprep.subr.mxu0 %v261_v46  ;;  %v1630_v45 = vshrl.u32 %v276_v44, 7 }
  0x30   :  { %299 = vmatpush1.msra.mxu0 %v260_v47  ;;  %v274_v47 = vld [vmem:[%s2009_s7] sm:$0x3] }
  0x31   :  { %300 = vmatprep.subr.mxu0 %v259_v48  ;;  %v278_v46 = vsub.s32 0, %v1630_v45  ;;  %v282_v48 = vsub.s32 1, %v1630_v45 }
  0x32   :  { %301 = vmatpush1.msra.mxu0 %v258_v49 }
  0x33   :  { %302 = vmatprep.subr.mxu0 %v257_v50  ;;  %v279_v49 = vrot.slane %v274_v47, %v278_v46  ;;  %v283_v50 = vrot.slane %v274_v47, %v282_v48  ;;  %v661_v47 = vld [vmem:[%s2012_s12 + $0x2e0] sm:$0xff] }
  0x34   :  { %303 = vmatpush1.msra.mxu0 %v256_v51 }
  0x35   :  { %304 = vmatprep.subr.mxu0 %v255_v52 }
  0x36   :  { %305 = vmatpush1.msra.mxu0 %v254_v53 }
  0x37   :  { %306 = vmatprep.subr.mxu0 %v253_v54 }
  0x38   :  { %307 = vmatpush1.msra.mxu0 %v252_v55 }
  0x39   :  { %308 = vmatprep.subr.mxu0 %v251_v56 }
  0x3a   :  { %309 = vmatpush1.msra.mxu0 %v250_v57 }
  0x3b   :  { %310 = vmatprep.subr.mxu0 %v249_v58 }
  0x3c   :  { %311 = vmatpush1.msra.mxu0 %v248_v59 }
  0x3d   :  { %312 = vmatprep.subr.mxu0 %v247_v3 }
  0x3e   :  { %313 = vmatpush1.msra.mxu0 %v246_v4 }
  0x3f   :  { %314 = vmatprep.subr.mxu0 %v245_v5  ;;  %v374_v5 = vld [vmem:[%s2011_s1] sm:$0xff] }
  0x40   :  { %315 = vmatpush1.msra.mxu0 %v244_v6 }
  0x41   :  { %316 = vmatprep.subr.mxu0 %v243_v7 }
  0x42   :  { %317 = vmatpush1.msra.mxu0 %v242_v8 }
  0x43   :  { %1144 = vmatprep.subr.mxu0 %v1189_v0 }
  0xe1   :  { %v139_v61 = vpop.f32.mrf.mxu0 }
  0xe2   :  { %v140_v62 = vadd.f32 %v967_v60, %v139_v61 }
  0xe3   :  { %v1073_v63 = vpop.f32.mrf.mxu0 }
  0xe4   :  { %v144_v1 = vmul.f32 0.2, %v140_v62  ;;  %vm143_vm1 = vcmp.ge.f32.partialorder %v140_v62, 0.0 }
  0xe6   :  { %v145_v2 = vsel %vm143_vm1, %v140_v62, %v144_v1 }
  0xe7   :  { %1107 = vmatmul.mubr.f32.vlgmr.msra.gmra.mxu1 %v145_v2 }
  0xe8   :  { %1141 = vmatprep.mubr.msk.f32.mxu1 %vm1190_vm0, %v1189_v0  ;;  %1110 = vmatpush3.msra.mxu1 %v392_v15  ;;  %v654_v15 = vld [vmem:[%s2012_s12 + $0x2a8] sm:$0xff] }
  0xe9   :  { %1111 = vmatprep.subr.mxu1 %v1189_v0 }
  0xea   :  { %1112 = vmatpush3.msra.mxu1 %v391_v16  ;;  %v653_v16 = vld [vmem:[%s2012_s12 + $0x2a0] sm:$0xff] }
  0xeb   :  { %1113 = vmatprep.subr.mxu1 %v1189_v0 }
  0xec   :  { %1114 = vmatpush3.msra.mxu1 %v390_v17  ;;  %v648_v17 = vld [vmem:[%s2012_s12 + $0x278] sm:$0xff] }
  0xed   :  { %1115 = vmatprep.subr.mxu1 %v1189_v0 }
  0xee   :  { %1116 = vmatpush3.msra.mxu1 %v389_v18  ;;  %v647_v18 = vld [vmem:[%s2012_s12 + $0x270] sm:$0xff] }
  0xef   :  { %1117 = vmatprep.subr.mxu1 %v1189_v0 }
  0xf0   :  { %1118 = vmatpush3.msra.mxu1 %v388_v19  ;;  %v642_v19 = vld [vmem:[%s2012_s12 + $0x248] sm:$0xff] }
  0xf1   :  { %1119 = vmatprep.subr.mxu1 %v1189_v0 }
  0xf2   :  { %1120 = vmatpush3.msra.mxu1 %v387_v20  ;;  %v641_v20 = vld [vmem:[%s2012_s12 + $0x240] sm:$0xff] }
  0xf3   :  { %1121 = vmatprep.subr.mxu1 %v1189_v0 }
  0xf4   :  { %1122 = vmatpush3.msra.mxu1 %v386_v21  ;;  %v636_v21 = vld [vmem:[%s2012_s12 + $0x218] sm:$0xff] }
  0xf5   :  { %1123 = vmatprep.subr.mxu1 %v1189_v0 }
  0xf6   :  { %1124 = vmatpush3.msra.mxu1 %v385_v22  ;;  %v635_v22 = vld [vmem:[%s2012_s12 + $0x210] sm:$0xff] }
  0xf7   :  { %1125 = vmatprep.subr.mxu1 %v1189_v0 }
  0xf8   :  { %1126 = vmatpush3.msra.mxu1 %v384_v23  ;;  %v630_v23 = vld [vmem:[%s2012_s12 + $0x1e8] sm:$0xff] }
  0xf9   :  { %1127 = vmatprep.subr.mxu1 %v1189_v0 }
  0xfa   :  { %1128 = vmatpush3.msra.mxu1 %v383_v24  ;;  %v629_v24 = vld [vmem:[%s2012_s12 + $0x1e0] sm:$0xff] }
  0xfb   :  { %1129 = vmatprep.subr.mxu1 %v1189_v0 }
  0xfc   :  { %1130 = vmatpush3.msra.mxu1 %v382_v25  ;;  %v624_v25 = vld [vmem:[%s2012_s12 + $0x1b8] sm:$0xff] }
  0xfd   :  { %1131 = vmatprep.subr.mxu1 %v1189_v0 }
  0xfe   :  { %1132 = vmatpush3.msra.mxu1 %v381_v26  ;;  %v623_v26 = vld [vmem:[%s2012_s12 + $0x1b0] sm:$0xff] }
  0xff   :  { %1133 = vmatprep.subr.mxu1 %v1189_v0 }
 0x100   :  { %1134 = vmatpush3.msra.mxu1 %v380_v27  ;;  %v618_v27 = vld [vmem:[%s2012_s12 + $0x188] sm:$0xff] }
 0x101   :  { %1135 = vmatprep.subr.mxu1 %v1189_v0 }
 0x102   :  { %1136 = vmatpush3.msra.mxu1 %v379_v28  ;;  %v617_v28 = vld [vmem:[%s2012_s12 + $0x180] sm:$0xff] }
 0x103   :  { %1137 = vmatprep.subr.mxu1 %v1189_v0 }
 0x104   :  { %1138 = vmatpush3.msra.mxu1 %v378_v29  ;;  %v612_v29 = vld [vmem:[%s2012_s12 + $0x158] sm:$0xff] }
 0x105   :  { %1139 = vmatprep.subr.mxu1 %v1189_v0 }
 0x106   :  { %1140 = vmatpush3.msra.mxu1 %v377_v30  ;;  %v611_v30 = vld [vmem:[%s2012_s12 + $0x150] sm:$0xff] }
 0x1a7   :  { %v235_v10 = vpop.f32.mrf.mxu1 }
 0x1a8   :  { %v236_v11 = vadd.f32 %v968_v9, %v235_v10  ;;  %v475_v9 = vld [vmem:[%s2008_s10 + $0x10] sm:$0xff]  ;;  %v474_v10 = vld [vmem:[%s2008_s10 + $0x8] sm:$0xff] }
 0x1a9   :  { %v1108_v12 = vpop.f32.mrf.mxu1 }
 0x1aa   :  { %vm239_vm2 = vcmp.ge.f32.partialorder %v236_v11, 0.0  ;;  %v240_v13 = vmul.f32 0.2, %v236_v11  ;;  %v660_v12 = vld [vmem:[%s2012_s12 + $0x2d8] sm:$0xff] }
 0x1ab   :  { %697 = vmatprep.subr.mxu1 %v660_v12  ;;  %v584_v12 = vld [vmem:[%s2012_s12 + $0x78] sm:$0xff] }
 0x1ac   :  { %v241_v14 = vsel %vm239_vm2, %v236_v11, %v240_v13  ;;  %v473_v11 = vld [vmem:[%s2008_s10] sm:$0xff]  ;;  %v659_v13 = vld [vmem:[%s2012_s12 + $0x2d0] sm:$0xff] }
 0x1ad   :  { %351 = vmatmul.mubr.f32.vlgmr.msra.gmra.mxu0 %v241_v14  ;;  %v662_v14 = vld [vmem:[%s2012_s12 + $0x2e8] sm:$0xff] }
 0x1ae   :  { %1176 = vmatprep.mubr.msk.f32.mxu0 %vm1190_vm0, %v1189_v0  ;;  %1145 = vmatpush3.msra.mxu0 %v488_v31  ;;  %v606_v31 = vld [vmem:[%s2012_s12 + $0x128] sm:$0xff] }
 0x1af   :  { %1146 = vmatprep.subr.mxu0 %v1189_v0 }
 0x1b0   :  { %1147 = vmatpush3.msra.mxu0 %v487_v32  ;;  %v605_v32 = vld [vmem:[%s2012_s12 + $0x120] sm:$0xff] }
 0x1b1   :  { %1148 = vmatprep.subr.mxu0 %v1189_v0 }
 0x1b2   :  { %1149 = vmatpush3.msra.mxu0 %v486_v33  ;;  %v600_v33 = vld [vmem:[%s2012_s12 + $0xf8] sm:$0xff] }
 0x1b3   :  { %1150 = vmatprep.subr.mxu0 %v1189_v0 }
 0x1b4   :  { %1151 = vmatpush3.msra.mxu0 %v485_v34  ;;  %v599_v34 = vld [vmem:[%s2012_s12 + $0xf0] sm:$0xff] }
 0x1b5   :  { %1152 = vmatprep.subr.mxu0 %v1189_v0 }
 0x1b6   :  { %1153 = vmatpush3.msra.mxu0 %v484_v35  ;;  %v594_v35 = vld [vmem:[%s2012_s12 + $0xc8] sm:$0xff] }
 0x1b7   :  { %1154 = vmatprep.subr.mxu0 %v1189_v0 }
 0x1b8   :  { %1155 = vmatpush3.msra.mxu0 %v483_v36  ;;  %v593_v36 = vld [vmem:[%s2012_s12 + $0xc0] sm:$0xff] }
 0x1b9   :  { %1156 = vmatprep.subr.mxu0 %v1189_v0 }
 0x1ba   :  { %1157 = vmatpush3.msra.mxu0 %v482_v37  ;;  %v588_v37 = vld [vmem:[%s2012_s12 + $0x98] sm:$0xff] }
 0x1bb   :  { %1158 = vmatprep.subr.mxu0 %v1189_v0 }
 0x1bc   :  { %1159 = vmatpush3.msra.mxu0 %v481_v38  ;;  %v587_v38 = vld [vmem:[%s2012_s12 + $0x90] sm:$0xff] }
 0x1bd   :  { %1160 = vmatprep.subr.mxu0 %v1189_v0 }
 0x1be   :  { %1161 = vmatpush3.msra.mxu0 %v480_v39  ;;  %v582_v39 = vld [vmem:[%s2012_s12 + $0x68] sm:$0xff] }
 0x1bf   :  { %1162 = vmatprep.subr.mxu0 %v1189_v0 }
 0x1c0   :  { %1163 = vmatpush3.msra.mxu0 %v479_v40  ;;  %v969_v40 = vld [vmem:[%s2013_s9] ss:$0 sm:$0xff] }
 0x1c1   :  { %1164 = vmatprep.subr.mxu0 %v1189_v0 }
 0x1c2   :  { %1165 = vmatpush3.msra.mxu0 %v478_v41 }
 0x1c3   :  { %1166 = vmatprep.subr.mxu0 %v1189_v0 }
 0x1c4   :  { %1167 = vmatpush3.msra.mxu0 %v477_v42 }
 0x1c5   :  { %1168 = vmatprep.subr.mxu0 %v1189_v0 }
 0x1c6   :  { %1169 = vmatpush3.msra.mxu0 %v476_v43 }
 0x1c7   :  { %1170 = vmatprep.subr.mxu0 %v1189_v0 }
 0x1c8   :  { %1171 = vmatpush3.msra.mxu0 %v475_v9  ;;  %v590_v9 = vld [vmem:[%s2012_s12 + $0xa8] sm:$0xff] }
 0x1c9   :  { %1172 = vmatprep.subr.mxu0 %v1189_v0 }
 0x1ca   :  { %1173 = vmatpush3.msra.mxu0 %v474_v10  ;;  %v589_v10 = vld [vmem:[%s2012_s12 + $0xa0] sm:$0xff] }
 0x1cb   :  { %1174 = vmatprep.subr.mxu0 %v1189_v0 }
 0x1cc   :  { %1175 = vmatpush3.msra.mxu0 %v473_v11  ;;  %v581_v11 = vld [vmem:[%s2012_s12 + $0x60] sm:$0xff] }
 0x1cd   :  { %768 = vmatprep.subr.mxu0 %v662_v14  ;;  %v583_v14 = vld [vmem:[%s2012_s12 + $0x70] sm:$0xff] }
 0x26d   :  { %v352_v51 = vpop.f32.mrf.mxu0 }
 0x26e   :  { %v353_v52 = vadd.f32 %v352_v51, %v279_v49  ;;  %v655_v51 = vld [vmem:[%s2012_s12 + $0x2b0] sm:$0xff] }
 0x26f   :  { %v354_v53 = vpop.f32.mrf.mxu0 }
 0x270   :  { %372 = vst [vmem:[%s2010_s14] sm:$0xff] %v353_v52  ;;  %v355_v54 = vadd.f32 %v354_v53, %v283_v50  ;;  %v656_v50 = vld [vmem:[%s2012_s12 + $0x2b8] sm:$0xff]  ;;  %v649_v53 = vld [vmem:[%s2012_s12 + $0x280] sm:$0xff] }
 0x272   :  { %v358_v55 = vand.u32 2147483647, %v355_v54  ;;  %v357_v3 = vmax.f32 %v355_v54, 0.0  ;;  %v644_v54 = vld [vmem:[%s2012_s12 + $0x258] sm:$0xff] }
 0x274   :  { %v359_v56 = vsub.f32 0.0, %v358_v55  ;;  %v643_v55 = vld [vmem:[%s2012_s12 + $0x250] sm:$0xff] }
 0x276   :  { %v360_v57 = vmul.f32 1.442695, %v359_v56  ;;  %v638_v56 = vld [vmem:[%s2012_s12 + $0x228] sm:$0xff] }
 0x278   :  { %1181 = vpow2.f32 %v360_v57  ;;  %v637_v57 = vld [vmem:[%s2012_s12 + $0x220] sm:$0xff] }
 0x285   :  { %v1182_v58 = vpop.eup %1181 }
 0x286   :  { %v362_v59 = vadd.f32 1.0, %v1182_v58  ;;  %v365_v60 = vmul.f32 -0.5, %v1182_v58  ;;  %v368_v62 = vand.u32 2147483647, %v1182_v58 }
 0x288   :  { %1183 = vlog2.f32 %v362_v59  ;;  %v366_v61 = vadd.f32 1.0, %v365_v60  ;;  %vm369_vm3 = vcmp.lt.f32.partialorder %v368_v62, 0.0004427343  ;;  %v631_v59 = vld [vmem:[%s2012_s12 + $0x1f0] sm:$0xff]  ;;  %v626_v60 = vld [vmem:[%s2012_s12 + $0x1c8] sm:$0xff]  ;;  %v620_v62 = vld [vmem:[%s2012_s12 + $0x198] sm:$0xff] }
 0x28a   :  { %v367_v2 = vmul.f32 %v1182_v58, %v366_v61  ;;  %v632_v58 = vld [vmem:[%s2012_s12 + $0x1f8] sm:$0xff]  ;;  %v625_v61 = vld [vmem:[%s2012_s12 + $0x1c0] sm:$0xff] }
 0x295   :  { %v1184_v63 = vpop.eup %1183 }
 0x296   :  { %v364_v1 = vmul.f32 0.6931472, %v1184_v63  ;;  %v619_v63 = vld [vmem:[%s2012_s12 + $0x190] sm:$0xff] }
 0x298   :  { %v370_v4 = vsel %vm369_vm3, %v367_v2, %v364_v1  ;;  %v614_v1 = vld [vmem:[%s2012_s12 + $0x168] sm:$0xff]  ;;  %v613_v2 = vld [vmem:[%s2012_s12 + $0x160] sm:$0xff] }
 0x299   :  { %v371_v6 = vadd.f32 %v370_v4, %v357_v3  ;;  %v608_v3 = vld [vmem:[%s2012_s12 + $0x138] sm:$0xff]  ;;  %v607_v4 = vld [vmem:[%s2012_s12 + $0x130] sm:$0xff] }
 0x29b   :  { %373 = vst [vmem:[%s2010_s14 + $0x8] sm:$0xff] %v371_v6  ;;  %v375_v7 = vmul.f32 %v374_v5, %v371_v6  ;;  %v602_v5 = vld [vmem:[%s2012_s12 + $0x108] sm:$0xff]  ;;  %v601_v6 = vld [vmem:[%s2012_s12 + $0x100] sm:$0xff] }
 0x29d   :  { %v376_v8 = vadd.f32 %v375_v7, %v353_v52  ;;  %v650_v52 = vld [vmem:[%s2012_s12 + $0x288] sm:$0xff]  ;;  %v596_v7 = vld [vmem:[%s2012_s12 + $0xd8] sm:$0xff] }
 0x29f   :  { %1142 = vmatmul.mubr.f32.vlgmr.msra.gmra.mxu1 %v376_v8  ;;  %v595_v8 = vld [vmem:[%s2012_s12 + $0xd0] sm:$0xff] }
 0x2a0   :  { %761 = vmatprep.mubr.f32.mxu1 %v1189_v0  ;;  %698 = vmatpush1.msra.mxu1 %v659_v13  ;;  %v576_v13 = vld [vmem:[%s2012_s12 + $0x38] sm:$0xff] }
 0x2a1   :  { %699 = vmatprep.subr.mxu1 %v654_v15  ;;  %v575_v15 = vld [vmem:[%s2012_s12 + $0x30] sm:$0xff] }
 0x2a2   :  { %700 = vmatpush1.msra.mxu1 %v653_v16  ;;  %v578_v16 = vld [vmem:[%s2012_s12 + $0x48] sm:$0xff] }
 0x2a3   :  { %701 = vmatprep.subr.mxu1 %v648_v17  ;;  %v570_v17 = vld [vmem:[%s2012_s12 + $0x8] sm:$0xff] }
 0x2a4   :  { %702 = vmatpush1.msra.mxu1 %v647_v18  ;;  %v577_v18 = vld [vmem:[%s2012_s12 + $0x40] sm:$0xff] }
 0x2a5   :  { %703 = vmatprep.subr.mxu1 %v642_v19  ;;  %v569_v19 = vld [vmem:[%s2012_s12] sm:$0xff] }
 0x2a6   :  { %704 = vmatpush1.msra.mxu1 %v641_v20  ;;  %v572_v20 = vld [vmem:[%s2012_s12 + $0x18] sm:$0xff] }
 0x2a7   :  { %705 = vmatprep.subr.mxu1 %v636_v21  ;;  %v571_v21 = vld [vmem:[%s2012_s12 + $0x10] sm:$0xff] }
 0x2a8   :  { %706 = vmatpush1.msra.mxu1 %v635_v22  ;;  %v664_v22 = vld [vmem:[%s2012_s12 + $0x2f8] sm:$0xff] }
 0x2a9   :  { %707 = vmatprep.subr.mxu1 %v630_v23  ;;  %v970_v23 = vld [vmem:[%s2014_s11] ss:$0 sm:$0xff] }
 0x2aa   :  { %708 = vmatpush1.msra.mxu1 %v629_v24 }
 0x2ab   :  { %709 = vmatprep.subr.mxu1 %v624_v25 }
 0x2ac   :  { %710 = vmatpush1.msra.mxu1 %v623_v26 }
 0x2ad   :  { %711 = vmatprep.subr.mxu1 %v618_v27 }
 0x2ae   :  { %712 = vmatpush1.msra.mxu1 %v617_v28  ;;  %v663_v28 = vld [vmem:[%s2012_s12 + $0x2f0] sm:$0xff] }
 0x2af   :  { %713 = vmatprep.subr.mxu1 %v612_v29 }
 0x2b0   :  { %714 = vmatpush1.msra.mxu1 %v611_v30  ;;  %v658_v30 = vld [vmem:[%s2012_s12 + $0x2c8] sm:$0xff] }
 0x2b1   :  { %715 = vmatprep.subr.mxu1 %v606_v31  ;;  %v657_v31 = vld [vmem:[%s2012_s12 + $0x2c0] sm:$0xff] }
 0x2b2   :  { %716 = vmatpush1.msra.mxu1 %v605_v32  ;;  %v652_v32 = vld [vmem:[%s2012_s12 + $0x298] sm:$0xff] }
 0x2b3   :  { %717 = vmatprep.subr.mxu1 %v600_v33  ;;  %v651_v33 = vld [vmem:[%s2012_s12 + $0x290] sm:$0xff] }
 0x2b4   :  { %718 = vmatpush1.msra.mxu1 %v599_v34  ;;  %v646_v34 = vld [vmem:[%s2012_s12 + $0x268] sm:$0xff] }
 0x2b5   :  { %719 = vmatprep.subr.mxu1 %v594_v35  ;;  %v645_v35 = vld [vmem:[%s2012_s12 + $0x260] sm:$0xff] }
 0x2b6   :  { %720 = vmatpush1.msra.mxu1 %v593_v36  ;;  %v639_v36 = vld [vmem:[%s2012_s12 + $0x230] sm:$0xff] }
 0x2b7   :  { %721 = vmatprep.subr.mxu1 %v588_v37  ;;  %v634_v37 = vld [vmem:[%s2012_s12 + $0x208] sm:$0xff] }
 0x2b8   :  { %722 = vmatpush1.msra.mxu1 %v587_v38  ;;  %v633_v38 = vld [vmem:[%s2012_s12 + $0x200] sm:$0xff] }
 0x2b9   :  { %723 = vmatprep.subr.mxu1 %v582_v39  ;;  %v628_v39 = vld [vmem:[%s2012_s12 + $0x1d8] sm:$0xff] }
 0x2ba   :  { %724 = vmatpush1.msra.mxu1 %v581_v11 }
 0x2bb   :  { %725 = vmatprep.subr.mxu1 %v576_v13 }
 0x2bc   :  { %726 = vmatpush1.msra.mxu1 %v575_v15 }
 0x2bd   :  { %727 = vmatprep.subr.mxu1 %v570_v17 }
 0x2be   :  { %728 = vmatpush1.msra.mxu1 %v569_v19 }
 0x2bf   :  { %839 = vmatprep.subr.mxu1 %v664_v22 }
 0x35f   :  { %v466_v41 = vpop.f32.mrf.mxu1 }
 0x360   :  { %v467_v42 = vadd.f32 %v969_v40, %v466_v41  ;;  %v627_v40 = vld [vmem:[%s2012_s12 + $0x1d0] sm:$0xff]  ;;  %v622_v41 = vld [vmem:[%s2012_s12 + $0x1a8] sm:$0xff] }
 0x361   :  { %v1143_v43 = vpop.f32.mrf.mxu1 }
 0x362   :  { %vm470_vm4 = vcmp.ge.f32.partialorder %v467_v42, 0.0  ;;  %v471_v44 = vmul.f32 0.2, %v467_v42  ;;  %v616_v43 = vld [vmem:[%s2012_s12 + $0x178] sm:$0xff] }
 0x364   :  { %v472_v49 = vsel %vm470_vm4, %v467_v42, %v471_v44  ;;  %v621_v42 = vld [vmem:[%s2012_s12 + $0x1a0] sm:$0xff]  ;;  %v615_v44 = vld [vmem:[%s2012_s12 + $0x170] sm:$0xff] }
 0x365   :  { %1177 = vmatmul.mubr.f32.vlgmr.msra.gmra.mxu0 %v472_v49  ;;  %v609_v49 = vld [vmem:[%s2012_s12 + $0x140] sm:$0xff] }
 0x366   :  { %769 = vmatpush1.msra.mxu0 %v661_v47  ;;  %832 = vmatprep.mubr.f32.mxu0 %v1189_v0  ;;  %v610_v47 = vld [vmem:[%s2012_s12 + $0x148] sm:$0xff] }
 0x367   :  { %770 = vmatprep.subr.mxu0 %v656_v50  ;;  %v604_v50 = vld [vmem:[%s2012_s12 + $0x118] sm:$0xff] }
 0x368   :  { %771 = vmatpush1.msra.mxu0 %v655_v51  ;;  %v603_v51 = vld [vmem:[%s2012_s12 + $0x110] sm:$0xff] }
 0x369   :  { %772 = vmatprep.subr.mxu0 %v650_v52  ;;  %v598_v52 = vld [vmem:[%s2012_s12 + $0xe8] sm:$0xff] }
 0x36a   :  { %773 = vmatpush1.msra.mxu0 %v649_v53  ;;  %v597_v53 = vld [vmem:[%s2012_s12 + $0xe0] sm:$0xff] }
 0x36b   :  { %774 = vmatprep.subr.mxu0 %v644_v54  ;;  %v592_v54 = vld [vmem:[%s2012_s12 + $0xb8] sm:$0xff] }
 0x36c   :  { %775 = vmatpush1.msra.mxu0 %v643_v55  ;;  %v591_v55 = vld [vmem:[%s2012_s12 + $0xb0] sm:$0xff] }
 0x36d   :  { %776 = vmatprep.subr.mxu0 %v638_v56  ;;  %v586_v56 = vld [vmem:[%s2012_s12 + $0x88] sm:$0xff] }
 0x36e   :  { %777 = vmatpush1.msra.mxu0 %v637_v57  ;;  %v585_v57 = vld [vmem:[%s2012_s12 + $0x80] sm:$0xff] }
 0x36f   :  { %778 = vmatprep.subr.mxu0 %v632_v58  ;;  %v580_v58 = vld [vmem:[%s2012_s12 + $0x58] sm:$0xff] }
 0x370   :  { %779 = vmatpush1.msra.mxu0 %v631_v59  ;;  %v579_v59 = vld [vmem:[%s2012_s12 + $0x50] sm:$0xff] }
 0x371   :  { %780 = vmatprep.subr.mxu0 %v626_v60  ;;  %v574_v60 = vld [vmem:[%s2012_s12 + $0x28] sm:$0xff] }
 0x372   :  { %781 = vmatpush1.msra.mxu0 %v625_v61  ;;  %v573_v61 = vld [vmem:[%s2012_s12 + $0x20] sm:$0xff] }
 0x373   :  { %782 = vmatprep.subr.mxu0 %v620_v62  ;;  %v677_v62 = vsub.s32 2, %v1630_v45 }
 0x374   :  { %783 = vmatpush1.msra.mxu0 %v619_v63  ;;  %v665_v63 = vld [vmem:[%s2015_s13] sm:$0x3f] }
 0x375   :  { %784 = vmatprep.subr.mxu0 %v614_v1  ;;  %v670_v1 = vrot.slane %v665_v63, %v278_v46  ;;  %v681_v46 = vsub.s32 3, %v1630_v45  ;;  %v674_v19 = vrot.slane %v665_v63, %v282_v48 }
 0x376   :  { %785 = vmatpush1.msra.mxu0 %v613_v2  ;;  %v678_v2 = vrot.slane %v665_v63, %v677_v62 }
 0x377   :  { %786 = vmatprep.subr.mxu0 %v608_v3 }
 0x378   :  { %787 = vmatpush1.msra.mxu0 %v607_v4 }
 0x379   :  { %788 = vmatprep.subr.mxu0 %v602_v5  ;;  %v685_v5 = vsub.s32 4, %v1630_v45 }
 0x37a   :  { %789 = vmatpush1.msra.mxu0 %v601_v6 }
 0x37b   :  { %790 = vmatprep.subr.mxu0 %v596_v7 }
 0x37c   :  { %791 = vmatpush1.msra.mxu0 %v595_v8  ;;  %v686_v8 = vrot.slane %v665_v63, %v685_v5 }
 0x37d   :  { %792 = vmatprep.subr.mxu0 %v590_v9 }
 0x37e   :  { %793 = vmatpush1.msra.mxu0 %v589_v10 }
 0x37f   :  { %794 = vmatprep.subr.mxu0 %v584_v12 }
 0x380   :  { %795 = vmatpush1.msra.mxu0 %v583_v14 }
 0x381   :  { %796 = vmatprep.subr.mxu0 %v578_v16 }
 0x382   :  { %797 = vmatpush1.msra.mxu0 %v577_v18  ;;  %v689_v18 = vsub.s32 5, %v1630_v45 }
 0x383   :  { %798 = vmatprep.subr.mxu0 %v572_v20  ;;  %v682_v20 = vrot.slane %v665_v63, %v681_v46 }
 0x384   :  { %799 = vmatpush1.msra.mxu0 %v571_v21  ;;  %v690_v22 = vrot.slane %v665_v63, %v689_v18 }
 0x425   :  { %v562_v24 = vpop.f32.mrf.mxu0 }
 0x426   :  { %v563_v25 = vadd.f32 %v970_v23, %v562_v24 }
 0x427   :  { %v1178_v26 = vpop.f32.mrf.mxu0 }
 0x428   :  { %vm566_vm5 = vcmp.ge.f32.partialorder %v563_v25, 0.0  ;;  %v567_v27 = vmul.f32 0.2, %v563_v25 }
 0x42a   :  { %v1867_v29 = vsel %vm566_vm5, %v563_v25, %v567_v27 }
 0x42b   :  { %762 = vmatmul.mubr.f32.vlgmr.msra.gmra.mxu1 %v1867_v29  ;;  %833 = vmatmul.mubr.f32.vlgmr.msra.gmra.mxu0 %v1867_v29 }
 0x42c   :  { %840 = vmatpush1.msra.mxu1 %v663_v28  ;;  %903 = vmatprep.mubr.f32.mxu1 %v1189_v0  ;;  %v640_v0 = vld [vmem:[%s2012_s12 + $0x238] sm:$0xff] }
 0x42d   :  { %841 = vmatprep.subr.mxu1 %v658_v30 }
 0x42e   :  { %842 = vmatpush1.msra.mxu1 %v657_v31 }
 0x42f   :  { %843 = vmatprep.subr.mxu1 %v652_v32 }
 0x430   :  { %844 = vmatpush1.msra.mxu1 %v651_v33 }
 0x431   :  { %845 = vmatprep.subr.mxu1 %v646_v34 }
 0x432   :  { %846 = vmatpush1.msra.mxu1 %v645_v35 }
 0x433   :  { %847 = vmatprep.subr.mxu1 %v640_v0 }
 0x434   :  { %848 = vmatpush1.msra.mxu1 %v639_v36 }
 0x435   :  { %849 = vmatprep.subr.mxu1 %v634_v37 }
 0x436   :  { %850 = vmatpush1.msra.mxu1 %v633_v38 }
 0x437   :  { %851 = vmatprep.subr.mxu1 %v628_v39 }
 0x438   :  { %852 = vmatpush1.msra.mxu1 %v627_v40 }
 0x439   :  { %853 = vmatprep.subr.mxu1 %v622_v41 }
 0x43a   :  { %854 = vmatpush1.msra.mxu1 %v621_v42 }
 0x43b   :  { %855 = vmatprep.subr.mxu1 %v616_v43 }
 0x43c   :  { %856 = vmatpush1.msra.mxu1 %v615_v44 }
 0x43d   :  { %857 = vmatprep.subr.mxu1 %v610_v47 }
 0x43e   :  { %858 = vmatpush1.msra.mxu1 %v609_v49 }
 0x43f   :  { %859 = vmatprep.subr.mxu1 %v604_v50 }
 0x440   :  { %860 = vmatpush1.msra.mxu1 %v603_v51 }
 0x441   :  { %861 = vmatprep.subr.mxu1 %v598_v52 }
 0x442   :  { %862 = vmatpush1.msra.mxu1 %v597_v53 }
 0x443   :  { %863 = vmatprep.subr.mxu1 %v592_v54 }
 0x444   :  { %864 = vmatpush1.msra.mxu1 %v591_v55 }
 0x445   :  { %865 = vmatprep.subr.mxu1 %v586_v56 }
 0x446   :  { %866 = vmatpush1.msra.mxu1 %v585_v57 }
 0x447   :  { %867 = vmatprep.subr.mxu1 %v580_v58 }
 0x448   :  { %868 = vmatpush1.msra.mxu1 %v579_v59 }
 0x449   :  { %869 = vmatprep.subr.mxu1 %v574_v60 }
 0x44a   :  { %870 = vmatpush1.msra.mxu1 %v573_v61 }
 0x44b   :  { %904 = vmatmul.mubr.f32.vlgmr.msra.gmra.mxu1 %v1867_v29 }
 0x4eb   :  { %v763_v3 = vpop.f32.mrf.mxu1  ;;  %v834_v4 = vpop.f32.mrf.mxu0 }
 0x4ec   :  { %v764_v6 = vadd.f32 %v763_v3, %v670_v1  ;;  %v835_v7 = vadd.f32 %v834_v4, %v678_v2 }
 0x4ed   :  { %v765_v9 = vpop.f32.mrf.mxu1  ;;  %v836_v21 = vpop.f32.mrf.mxu0 }
 0x4ee   :  { %v910_v10 = vmul.f32 %v764_v6, %v764_v6  ;;  %v911_v11 = vmul.f32 %v835_v7, %v835_v7  ;;  %v766_v24 = vadd.f32 %v765_v9, %v674_v19  ;;  %v837_v26 = vadd.f32 %v836_v21, %v682_v20 }
 0x4f0   :  { %v912_v14 = vadd.f32 %v911_v11, %v910_v10 }
 0x50b   :  { %v905_v12 = vpop.f32.mrf.mxu1 }
 0x50c   :  { %v906_v13 = vadd.f32 %v905_v12, %v686_v8 }
 0x50d   :  { %v907_v25 = vpop.f32.mrf.mxu1 }
 0x50e   :  { %v913_v15 = vmul.f32 %v906_v13, %v906_v13  ;;  %v908_v30 = vadd.f32 %v907_v25, %v690_v22 }
 0x510   :  { %v914_v16 = vadd.f32 %v913_v15, %v912_v14 }
 0x512   :  { %v915_v17 = vmax.f32 %v914_v16, 1e-24 }
 0x514   :  { %1185 = vrsqrt.f32 %v915_v17 }
 0x521   :  { %v1186_v23 = vpop.eup %1185 }
 0x522   :  { %v919_v27 = vmul.f32 %v1186_v23, %v906_v13  ;;  %v917_v28 = vmul.f32 %v1186_v23, %v764_v6  ;;  %v918_v29 = vmul.f32 %v1186_v23, %v835_v7 }
 0x524   :  { %922 = vst [vmem:[%s2016_s15 + $0x30] sm:$0xff] %v919_v27  ;;  %920 = vst [vmem:[%s2016_s15] sm:$0xff] %v917_v28  ;;  %v923_v45 = vmul.f32 %v917_v28, %v766_v24  ;;  %v924_v48 = vmul.f32 %v918_v29, %v837_v26  ;;  %v926_v32 = vmul.f32 %v919_v27, %v908_v30 }
 0x525   :  { %921 = vst [vmem:[%s2016_s15 + $0x18] sm:$0xff] %v918_v29 }
 0x526   :  { %v925_v31 = vadd.f32 %v924_v48, %v923_v45 }
 0x528   :  { %v927_v33 = vadd.f32 %v926_v32, %v925_v31 }
 0x52a   :  { %v928_v34 = vmul.f32 %v927_v33, %v917_v28  ;;  %v930_v35 = vmul.f32 %v927_v33, %v918_v29  ;;  %v932_v0 = vmul.f32 %v927_v33, %v919_v27 }
 0x52c   :  { %v929_v36 = vsub.f32 %v766_v24, %v928_v34  ;;  %v931_v37 = vsub.f32 %v837_v26, %v930_v35  ;;  %v933_v38 = vsub.f32 %v908_v30, %v932_v0 }
 0x52e   :  { %v934_v39 = vmul.f32 %v929_v36, %v929_v36  ;;  %v935_v40 = vmul.f32 %v931_v37, %v931_v37  ;;  %v937_v42 = vmul.f32 %v933_v38, %v933_v38 }
 0x530   :  { %v936_v41 = vadd.f32 %v935_v40, %v934_v39 }
 0x532   :  { %v938_v43 = vadd.f32 %v937_v42, %v936_v41 }
 0x534   :  { %v939_v44 = vmax.f32 %v938_v43, 1e-24 }
 0x536   :  { %1187 = vrsqrt.f32 %v939_v44 }
 0x543   :  { %v1188_v47 = vpop.eup %1187 }
 0x544   :  { %v941_v49 = vmul.f32 %v1188_v47, %v929_v36  ;;  %v942_v50 = vmul.f32 %v1188_v47, %v931_v37  ;;  %v943_v51 = vmul.f32 %v1188_v47, %v933_v38 }
 0x546   :  { %944 = vst [vmem:[%s2016_s15 + $0x8] sm:$0xff] %v941_v49  ;;  %945 = vst [vmem:[%s2016_s15 + $0x20] sm:$0xff] %v942_v50  ;;  %v947_v52 = vmul.f32 %v943_v51, %v918_v29  ;;  %v948_v53 = vmul.f32 %v942_v50, %v919_v27  ;;  %v951_v54 = vmul.f32 %v941_v49, %v919_v27 }
 0x547   :  { %946 = vst [vmem:[%s2016_s15 + $0x38] sm:$0xff] %v943_v51  ;;  %v952_v55 = vmul.f32 %v943_v51, %v917_v28  ;;  %v955_v56 = vmul.f32 %v942_v50, %v917_v28  ;;  %v956_v57 = vmul.f32 %v941_v49, %v918_v29 }
 0x548   :  { %v949_v58 = vsub.f32 %v947_v52, %v948_v53 }
 0x549   :  { %v953_v59 = vsub.f32 %v951_v54, %v952_v55  ;;  %v957_v60 = vsub.f32 %v955_v56, %v956_v57 }
 0x54a   :  { %950 = vst [vmem:[%s2016_s15 + $0x10] sm:$0xff] %v949_v58 }
 0x54b   :  { %954 = vst [vmem:[%s2016_s15 + $0x28] sm:$0xff] %v953_v59  ;;  %958 = vst [vmem:[%s2016_s15 + $0x40] sm:$0xff] %v957_v60 }

</bundles_post_ra>
